<compile_context>
chip_gen: v6e
topology: v6e:2x2x1
jax: 0.10.0
libtpu: 0.0.40
codegen_flags: <defaults>
</compile_context>

<pallas_src>
import functools

import jax
import jax.numpy as jnp
from jax import lax
from jax.experimental import pallas as pl
from jax.experimental.pallas import tpu as pltpu


def _make_ssd_loss_kernel(n_rows: int, tile_n: int, num_classes: int):
    """Builds the per-tile kernel; all args are static Python ints."""

    def kernel(loc_p_ref, loc_t_ref, cls_p_ref, cls_t_ref, out_ref):
        # ---- SmoothL1 partial sum over a lane-dense (tile_n*4//128, 128) block.
        # Cast in-kernel; inputs are streamed in their native dtype.
        d = loc_p_ref[...].astype(jnp.float32) - loc_t_ref[...].astype(jnp.float32)
        ad = jnp.abs(d)
        loc_partial = jnp.sum(jnp.where(ad < 1.0, 0.5 * d * d, ad - 0.5))

        # ---- CrossEntropy partial sum, class-major (C, tile_n) logits block.
        logits = cls_p_ref[...].astype(jnp.float32)                  # (C, tile_n)
        m = jnp.max(logits, axis=0, keepdims=True)                   # (1, tile_n)
        # exp stays f32 on every generation (v5e EUP has no bf16 path; after
        # the lane-density fix the EUP is far from saturated on v6e/v7x).
        lse = jnp.log(jnp.sum(jnp.exp(logits - m), axis=0, keepdims=True)) + m

        tgt = cls_t_ref[...]                                         # (1, tile_n) int32
        cls_row = lax.broadcasted_iota(jnp.int32, (num_classes, 1), 0)  # tiny iota
        picked = jnp.sum(jnp.where(cls_row == tgt, logits, 0.0),
                         axis=0, keepdims=True)                      # logits[tgt[j], j]
        per_col = lse - picked                                       # (1, tile_n)

        # Mask padded / ragged columns of the last block.  Must be a select
        # (not multiply-by-mask) so boundary garbage / NaN never propagates.
        col = (lax.broadcasted_iota(jnp.int32, (1, tile_n), 1)
               + pl.program_id(0) * tile_n)
        cls_partial = jnp.sum(jnp.where(col < n_rows, per_col, 0.0))

        # ---- Lane-dense (1, 8, 128) partial-sum block:
        #      sublane 0 -> loc partial, sublane 1 -> cls partial.
        sub = lax.broadcasted_iota(jnp.int32, out_ref.shape, 1)
        out_ref[...] = jnp.where(sub == 0, loc_partial,
                                 jnp.where(sub == 1, cls_partial, 0.0))

    return kernel


@functools.partial(jax.jit, static_argnames=("tile_n",))
def ssd_loss(loc_preds, loc_targets, cls_preds, cls_targets, tile_n: int = 4096):
    """mean SmoothL1(loc_preds, loc_targets) + mean CrossEntropy(cls_preds, cls_targets).

    loc_preds, loc_targets : (N, 4) float
    cls_preds              : (N, C) float logits
    cls_targets            : (N,)   int class indices (assumed valid, no ignore_index)
    """
    N, L = loc_preds.shape
    assert L == 4, "loc tensors must be (N, 4)"
    C = cls_preds.shape[1]

    def _round_up(x, m):
        return ((x + m - 1) // m) * m

    # ---- Tile sizing (static Python ints) -------------------------------
    # Multiple of 256 so the flattened loc tile is a whole number of (8, 128)
    # vreg tiles; aim for >= 2 tiles when N > 256 so both v7x TensorCores get
    # work; shrink if double-buffered blocks + f32 temps would crowd VMEM.
    tile = _round_up(max(int(tile_n), 256), 256)
    cap = _round_up(N, 256)
    if N > 256:
        cap = min(cap, _round_up(pl.cdiv(N, 2), 256))
    tile = min(tile, cap)

    itemsize = max(jnp.dtype(cls_preds.dtype).itemsize, 4)

    def _vmem_bytes(t):
        loc = 2 * (t * 4) * 4                   # two lane-dense loc blocks (f32)
        cls = C * t * itemsize                  # logits block (native dtype)
        tgt = 8 * t * 4                         # (1, t) i32 block, 8-sublane padded
        tmp = 4 * C * t * 4                     # in-kernel f32 temporaries
        return 2 * (loc + cls + tgt) + tmp      # 2x for double buffering

    while tile > 256 and _vmem_bytes(tile) > 24 * 1024 * 1024:
        tile -= 256

    num_tiles = pl.cdiv(N, tile)
    n_pad = num_tiles * tile
    loc_rows = tile * 4 // 128

    # ---- Lane-dense loc layout: (N, 4) -> flat -> zero pad -> (n_pad*4//128, 128).
    def _loc_dense(x):
        flat = x.reshape(-1)
        flat = jnp.pad(flat, (0, n_pad * 4 - flat.shape[0]))
        return flat.reshape(n_pad * 4 // 128, 128)

    loc_p = _loc_dense(loc_preds)
    loc_t = _loc_dense(loc_targets)

    # ---- Class-major logits (C, n_pad); pad fuses into the transpose copy.
    cls_p = cls_preds.T
    if n_pad != N:
        cls_p = jnp.pad(cls_p, ((0, 0), (0, n_pad - N)))

    # ---- Lane-dense targets (1, n_pad) int32, aligned with logits-block lanes.
    cls_t = jnp.pad(cls_targets.astype(jnp.int32), (0, n_pad - N)).reshape(1, n_pad)

    partials = pl.pallas_call(
        _make_ssd_loss_kernel(N, tile, C),
        out_shape=jax.ShapeDtypeStruct((num_tiles, 8, 128), jnp.float32),
        grid=(num_tiles,),
        in_specs=[
            pl.BlockSpec((loc_rows, 128), lambda i: (i, 0)),
            pl.BlockSpec((loc_rows, 128), lambda i: (i, 0)),
            pl.BlockSpec((C, tile), lambda i: (0, i)),
            pl.BlockSpec((1, tile), lambda i: (0, i)),
        ],
        out_specs=pl.BlockSpec((1, 8, 128), lambda i: (i, 0, 0)),
        compiler_params=pltpu.CompilerParams(
            dimension_semantics=("parallel",),   # let v7x shard tiles across TCs
            vmem_limit_bytes=32 * 1024 * 1024,   # load-bearing on v5e (16 MiB default)
        ),
    )(loc_p, loc_t, cls_p, cls_t)

    # Tiny final reduction + scaling in plain JAX (multiply by reciprocals).
    loc_sum = jnp.sum(partials[:, 0, 0])
    cls_sum = jnp.sum(partials[:, 1, 0])
    return loc_sum * (1.0 / (N * 4)) + cls_sum * (1.0 / N)


def ssd_loss_ref(loc_preds, loc_targets, cls_preds, cls_targets):
    # Pure-JAX reference (matches PyTorch SmoothL1Loss + CrossEntropyLoss defaults).
    d = loc_preds - loc_targets
    ad = jnp.abs(d)
    loss_loc = jnp.mean(jnp.where(ad < 1.0, 0.5 * d * d, ad - 0.5))
    logp = jax.nn.log_softmax(cls_preds, axis=-1)
    nll = -jnp.take_along_axis(logp, cls_targets[:, None], axis=-1)[:, 0]
    return loss_loc + jnp.mean(nll)


if __name__ == "__main__":
    key = jax.random.PRNGKey(0)

    # ---- small case (single tile) ----
    k1, k2, k3, k4 = jax.random.split(key, 4)
    N, C = 8, 16
    loc_preds = jax.random.normal(k1, (N, 4), dtype=jnp.float32)
    loc_targets = jax.random.normal(k2, (N, 4), dtype=jnp.float32)
    cls_preds = jax.random.normal(k3, (N, C), dtype=jnp.float32)
    cls_targets = jax.random.randint(k4, (N,), 0, C, dtype=jnp.int32)

    out = ssd_loss(loc_preds, loc_targets, cls_preds, cls_targets)
    jax.block_until_ready(out)
    ref = ssd_loss_ref(loc_preds, loc_targets, cls_preds, cls_targets)
    assert jnp.allclose(out, ref, rtol=1e-5, atol=1e-5), (out, ref)

    # ---- multi-tile case (exercises grid, ragged-column mask, partial reduction) ----
    k5, k6, k7, k8 = jax.random.split(jax.random.PRNGKey(1), 4)
    N2, C2 = 600, 21
    loc_preds2 = jax.random.normal(k5, (N2, 4), dtype=jnp.float32)
    loc_targets2 = jax.random.normal(k6, (N2, 4), dtype=jnp.float32)
    cls_preds2 = jax.random.normal(k7, (N2, C2), dtype=jnp.float32)
    cls_targets2 = jax.random.randint(k8, (N2,), 0, C2, dtype=jnp.int32)

    # explicit small tiles (3 tiles)
    out2 = ssd_loss(loc_preds2, loc_targets2, cls_preds2, cls_targets2, tile_n=256)
    jax.block_until_ready(out2)
    ref2 = ssd_loss_ref(loc_preds2, loc_targets2, cls_preds2, cls_targets2)
    assert jnp.allclose(out2, ref2, rtol=1e-4, atol=1e-4), (out2, ref2)

    # default tile sizing (caps to 2 tiles -> exercises the v7x even-split path)
    out3 = ssd_loss(loc_preds2, loc_targets2, cls_preds2, cls_targets2)
    jax.block_until_ready(out3)
    assert jnp.allclose(out3, ref2, rtol=1e-4, atol=1e-4), (out3, ref2)

    print("KERNEL_OK")
</pallas_src>

<mosaic_0001>
module attributes {stable_mosaic.version = 11 : i64} {
  func.func @kernel(%arg0: i32, %arg1: memref<8x128xf32, #tpu.memory_space<vmem>>, %arg2: memref<8x128xf32, #tpu.memory_space<vmem>>, %arg3: memref<16x256xf32, #tpu.memory_space<vmem>>, %arg4: memref<1x256xi32, #tpu.memory_space<vmem>>, %arg5: memref<1x8x128xf32, #tpu.memory_space<vmem>>) attributes {dimension_semantics = [#tpu.dimension_semantics<parallel>], iteration_bounds = array<i64: 1>, scalar_prefetch = 0 : i64, scratch_operands = 0 : i64, tpu.core_type = #tpu.core_type<tc>, window_params = [{transform_indices = @transform_0, window_bounds = array<i64: 8, 128>}, {transform_indices = @transform_1, window_bounds = array<i64: 8, 128>}, {transform_indices = @transform_2, window_bounds = array<i64: 16, 256>}, {transform_indices = @transform_3, window_bounds = array<i64: 1, 256>}, {transform_indices = @transform_4, window_bounds = array<i64: 1, 8, 128>}]} {
    %c0 = arith.constant 0 : index
    %c0_0 = arith.constant 0 : index
    %0 = vector.load %arg1[%c0, %c0_0] : memref<8x128xf32, #tpu.memory_space<vmem>>, vector<8x128xf32>
    %c0_1 = arith.constant 0 : index
    %c0_2 = arith.constant 0 : index
    %1 = vector.load %arg2[%c0_1, %c0_2] : memref<8x128xf32, #tpu.memory_space<vmem>>, vector<8x128xf32>
    %2 = arith.subf %0, %1 : vector<8x128xf32>
    %3 = math.absf %2 : vector<8x128xf32>
    %cst = arith.constant 1.000000e+00 : f32
    %4 = vector.broadcast %cst : f32 to vector<8x128xf32>
    %5 = arith.cmpf olt, %3, %4 : vector<8x128xf32>
    %cst_3 = arith.constant 5.000000e-01 : f32
    %6 = vector.broadcast %cst_3 : f32 to vector<8x128xf32>
    %7 = arith.mulf %6, %2 : vector<8x128xf32>
    %8 = arith.mulf %7, %2 : vector<8x128xf32>
    %cst_4 = arith.constant 5.000000e-01 : f32
    %9 = vector.broadcast %cst_4 : f32 to vector<8x128xf32>
    %10 = arith.subf %3, %9 : vector<8x128xf32>
    %11 = arith.select %5, %8, %10 : vector<8x128xi1>, vector<8x128xf32>
    %12 = vector.shape_cast %11 : vector<8x128xf32> to vector<1x8x128xf32>
    %cst_5 = arith.constant dense<0.000000e+00> : vector<1xf32>
    %13 = vector.multi_reduction <add>, %12, %cst_5 [1, 2] : vector<1x8x128xf32> to vector<1xf32>
    %14 = vector.shape_cast %13 : vector<1xf32> to vector<1x1x1xf32>
    %15 = vector.extract %14[0, 0, 0] : f32 from vector<1x1x1xf32>
    %c0_6 = arith.constant 0 : index
    %c0_7 = arith.constant 0 : index
    %16 = vector.load %arg3[%c0_6, %c0_7] : memref<16x256xf32, #tpu.memory_space<vmem>>, vector<16x256xf32>
    %cst_8 = arith.constant dense<0xFF800000> : vector<256xf32>
    %17 = vector.multi_reduction <maximumf>, %16, %cst_8 [0] : vector<16x256xf32> to vector<256xf32>
    %18 = vector.shape_cast %17 : vector<256xf32> to vector<1x256xf32>
    %19 = vector.broadcast %18 : vector<1x256xf32> to vector<16x256xf32>
    %20 = arith.subf %16, %19 : vector<16x256xf32>
    %21 = math.exp %20 : vector<16x256xf32>
    %cst_9 = arith.constant dense<0.000000e+00> : vector<256xf32>
    %22 = vector.multi_reduction <add>, %21, %cst_9 [0] : vector<16x256xf32> to vector<256xf32>
    %23 = vector.shape_cast %22 : vector<256xf32> to vector<1x256xf32>
    %24 = math.log %23 : vector<1x256xf32>
    %25 = arith.addf %24, %18 : vector<1x256xf32>
    %c0_10 = arith.constant 0 : index
    %c0_11 = arith.constant 0 : index
    %26 = vector.load %arg4[%c0_10, %c0_11] : memref<1x256xi32, #tpu.memory_space<vmem>>, vector<1x256xi32>
    %27 = tpu.iota {dimensions = array<i32: 0>} : vector<16x1xi32>
    %28 = vector.broadcast %27 : vector<16x1xi32> to vector<16x256xi32>
    %29 = vector.broadcast %26 : vector<1x256xi32> to vector<16x256xi32>
    %30 = arith.cmpi eq, %28, %29 : vector<16x256xi32>
    %cst_12 = arith.constant 0.000000e+00 : f32
    %31 = vector.broadcast %cst_12 : f32 to vector<16x256xf32>
    %32 = arith.select %30, %16, %31 : vector<16x256xi1>, vector<16x256xf32>
    %cst_13 = arith.constant dense<0.000000e+00> : vector<256xf32>
    %33 = vector.multi_reduction <add>, %32, %cst_13 [0] : vector<16x256xf32> to vector<256xf32>
    %34 = vector.shape_cast %33 : vector<256xf32> to vector<1x256xf32>
    %35 = arith.subf %25, %34 : vector<1x256xf32>
    %36 = tpu.iota {dimensions = array<i32: 1>} : vector<1x256xi32>
    %c256_i32 = arith.constant 256 : i32
    %37 = arith.muli %arg0, %c256_i32 : i32
    %38 = vector.broadcast %37 : i32 to vector<1x256xi32>
    %39 = arith.addi %36, %38 : vector<1x256xi32>
    %c8_i32 = arith.constant 8 : i32
    %40 = vector.broadcast %c8_i32 : i32 to vector<1x256xi32>
    %41 = arith.cmpi slt, %39, %40 : vector<1x256xi32>
    %cst_14 = arith.constant 0.000000e+00 : f32
    %42 = vector.broadcast %cst_14 : f32 to vector<1x256xf32>
    %43 = arith.select %41, %35, %42 : vector<1x256xi1>, vector<1x256xf32>
    %44 = vector.shape_cast %43 : vector<1x256xf32> to vector<1x1x256xf32>
    %cst_15 = arith.constant dense<0.000000e+00> : vector<1xf32>
    %45 = vector.multi_reduction <add>, %44, %cst_15 [1, 2] : vector<1x1x256xf32> to vector<1xf32>
    %46 = vector.shape_cast %45 : vector<1xf32> to vector<1x1x1xf32>
    %47 = vector.extract %46[0, 0, 0] : f32 from vector<1x1x1xf32>
    %48 = tpu.iota {dimensions = array<i32: 1>} : vector<1x8x128xi32>
    %c0_i32 = arith.constant 0 : i32
    %49 = vector.broadcast %c0_i32 : i32 to vector<1x8x128xi32>
    %50 = arith.cmpi eq, %48, %49 : vector<1x8x128xi32>
    %c1_i32 = arith.constant 1 : i32
    %51 = vector.broadcast %c1_i32 : i32 to vector<1x8x128xi32>
    %52 = arith.cmpi eq, %48, %51 : vector<1x8x128xi32>
    %cst_16 = arith.constant 0.000000e+00 : f32
    %53 = vector.broadcast %47 : f32 to vector<1x8x128xf32>
    %54 = vector.broadcast %cst_16 : f32 to vector<1x8x128xf32>
    %55 = arith.select %52, %53, %54 : vector<1x8x128xi1>, vector<1x8x128xf32>
    %56 = vector.broadcast %15 : f32 to vector<1x8x128xf32>
    %57 = arith.select %50, %56, %55 : vector<1x8x128xi1>, vector<1x8x128xf32>
    %c0_17 = arith.constant 0 : index
    %c0_18 = arith.constant 0 : index
    %c0_19 = arith.constant 0 : index
    %58 = vector.load %arg5[%c0_17, %c0_18, %c0_19] : memref<1x8x128xf32, #tpu.memory_space<vmem>>, vector<1x8x128xf32>
    tpu.vector_store %arg5[%c0_17, %c0_18, %c0_19], %57 {strides = array<i32>} : memref<1x8x128xf32, #tpu.memory_space<vmem>>, vector<1x8x128xf32>,
    return
  }
  func.func @transform_0(%arg0: i32) -> (i32, i32) {
    %c0_i32 = arith.constant 0 : i32
    %c0_i32_0 = arith.constant 0 : i32
    return %arg0, %c0_i32 : i32, i32
  }
  func.func @transform_1(%arg0: i32) -> (i32, i32) {
    %c0_i32 = arith.constant 0 : i32
    %c0_i32_0 = arith.constant 0 : i32
    return %arg0, %c0_i32 : i32, i32
  }
  func.func @transform_2(%arg0: i32) -> (i32, i32) {
    %c0_i32 = arith.constant 0 : i32
    %c0_i32_0 = arith.constant 0 : i32
    return %c0_i32, %arg0 : i32, i32
  }
  func.func @transform_3(%arg0: i32) -> (i32, i32) {
    %c0_i32 = arith.constant 0 : i32
    %c0_i32_0 = arith.constant 0 : i32
    return %c0_i32, %arg0 : i32, i32
  }
  func.func @transform_4(%arg0: i32) -> (i32, i32, i32) {
    %c0_i32 = arith.constant 0 : i32
    %c0_i32_0 = arith.constant 0 : i32
    %c0_i32_1 = arith.constant 0 : i32
    return %arg0, %c0_i32, %c0_i32_0 : i32, i32, i32
  }
}

</mosaic_0001>

<bundles_post_ra>
// kernel: ssd_loss.1
= control target key start
LH: loop header
LB: loop body
LE: loop exit
PB: predicated region body
PF: predicated region fallthrough
CT: control target
= control target key end

     0   :  { %v86_v19 = vlaneseq  ;;  %vm132_vm4 = vcmask 1040384   ;;  %s217_s0 = inlined_call_operand.vmem [shape: f32[8,128], index: 0, kind: input, shape index: {}]   ;;  %s218_s1 = inlined_call_operand.vmem [shape: f32[8,128], index: 1, kind: input, shape index: {}]   ;;  %s219_s2 = inlined_call_operand.vmem [shape: f32[16,256], index: 2, kind: input, shape index: {}]   ;;  %s220_s3 = inlined_call_operand.vmem [shape: s32[1,256], index: 3, kind: input, shape index: {}]   ;;  %s221_s4 = inlined_call_operand.vmem [shape: f32[1,8,128], index: 4, kind: output, shape index: {}]  }
   0x1   :  { %v17_v0 = vld [vmem:[%s217_s0] sm:$0xff]  ;;  %v37_v4 = vld [vmem:[%s219_s2 + $0x10] sm:$0xff] }
   0x2   :  { %v18_v1 = vld [vmem:[%s218_s1] sm:$0xff]  ;;  %v204_v22 = vshrl.u32 %v86_v19, 7  ;;  %v122_v45 = vand.u32 127, %v86_v19 }
   0x3   :  { %v35_v2 = vld [vmem:[%s219_s2] sm:$0xff]  ;;  %v19_v3 = vsub.f32 %v17_v0, %v18_v1 }
   0x4   :  { %v39_v5 = vmax.f32 %v35_v2, %v37_v4  ;;  %v91_v23 = vsub.s32 0, %v204_v22  ;;  %v85_v24 = vld [vmem:[%s220_s3] sm:$0x3]  ;;  %v88_v25 = vadd.s32 8, %v204_v22  ;;  %vm128_vm3 = vcmp.lt.s32.totalorder %v122_v45, 8 }
   0x5   :  { %v20_v6 = vand.u32 2147483647, %v19_v3  ;;  %v22_v7 = vmul.f32 0.5, %v19_v3  ;;  %vm146_vm5 = vcmp.eq.s32.totalorder %v204_v22, 1  ;;  %vm145_vm6 = vcmp.eq.s32.totalorder %v204_v22, 0 }
   0x6   :  { %v40_v8 = vrot.slane %v39_v5, 4  ;;  %v92_v26 = vrot.slane %v85_v24, %v91_v23 }
   0x7   :  { %vm21_vm0 = vcmp.lt.f32.partialorder %v20_v6, 1.0  ;;  %v23_v9 = vmul.f32 %v22_v7, %v19_v3  ;;  %v156_v10 = vadd.f32 -0.5, %v20_v6 }
   0x8   :  { %v41_v11 = vmax.f32 %v39_v5, %v40_v8  ;;  %vm97_vm1 = vcmp.eq.s32.totalorder %v204_v22, %v92_v26  ;;  %vm99_vm2 = vcmp.eq.s32.totalorder %v88_v25, %v92_v26 }
   0x9   :  { %v25_v12 = vsel %vm21_vm0, %v23_v9, %v156_v10  ;;  %v101_v30 = vsel %vm97_vm1, %v35_v2, 0.0  ;;  %v103_v31 = vsel %vm99_vm2, %v37_v4, 0.0 }
   0xa   :  { %26 = vadd.xlane.f32.xlu0 %v25_v12  ;;  %v42_v13 = vrot.slane %v41_v11, 2  ;;  %v105_v34 = vadd.f32 %v103_v31, %v101_v30 }
   0xc   :  { %v43_v14 = vmax.f32 %v41_v11, %v42_v13  ;;  %v106_v37 = vrot.slane %v105_v34, 4 }
   0xe   :  { %v44_v15 = vrot.slane %v43_v14, 1  ;;  %v107_v40 = vadd.f32 %v106_v37, %v105_v34 }
  0x10   :  { %v45_v16 = vmax.f32 %v43_v14, %v44_v15  ;;  %v108_v41 = vrot.slane %v107_v40, 2 }
  0x12   :  { %v53_v17 = vsub.f32 %v35_v2, %v45_v16  ;;  %v55_v18 = vsub.f32 %v37_v4, %v45_v16  ;;  %v109_v42 = vadd.f32 %v108_v41, %v107_v40 }
  0x14   :  { %v57_v20 = vmul.f32 1.442695, %v53_v17  ;;  %v61_v21 = vmul.f32 1.442695, %v55_v18  ;;  %v110_v43 = vrot.slane %v109_v42, 1 }
  0x16   :  { %161 = vpow2.f32 %v57_v20  ;;  %v111_v47 = vadd.f32 %v110_v43, %v109_v42 }
  0x17   :  { %163 = vpow2.f32 %v61_v21 }
  0x23   :  { %v162_v27 = vpop.eup %161 }
  0x24   :  { %v164_v28 = vpop.eup %163 }
  0x25   :  { %v65_v29 = vadd.f32 %v164_v28, %v162_v27 }
  0x27   :  { %v66_v32 = vrot.slane %v65_v29, 4 }
  0x29   :  { %v67_v33 = vadd.f32 %v66_v32, %v65_v29 }
  0x2b   :  { %v68_v35 = vrot.slane %v67_v33, 2 }
  0x2d   :  { %v69_v36 = vadd.f32 %v68_v35, %v67_v33 }
  0x2f   :  { %v70_v38 = vrot.slane %v69_v36, 1 }
  0x31   :  { %v71_v39 = vadd.f32 %v70_v38, %v69_v36 }
  0x33   :  { %165 = vlog2.f32 %v71_v39 }
  0x40   :  { %v166_v44 = vpop.eup %165 }
  0x41   :  { %v80_v46 = vmul.f32 0.6931472, %v166_v44 }
  0x43   :  { %v83_v48 = vadd.f32 %v80_v46, %v45_v16 }
  0x45   :  { %v119_v49 = vsub.f32 %v83_v48, %v111_v47 }
  0x47   :  { %v130_v50 = vsel %vm128_vm3, %v119_v49, 0.0 }
  0x48   :  { %v133_v51 = vsel %vm132_vm4, %v130_v50, 0.0 }
  0x49   :  { %136 = vadd.xlane.f32.xlu0 %v133_v51 }
  0x93   :  { %v27_v52 = vpop.xlane.xlu0 %26 }
  0x94   :  { %v28_v53 = vrot.slane %v27_v52, 4 }
  0x96   :  { %v29_v54 = vadd.f32 %v28_v53, %v27_v52 }
  0x98   :  { %v30_v55 = vrot.slane %v29_v54, 2 }
  0x9a   :  { %v31_v56 = vadd.f32 %v30_v55, %v29_v54 }
  0x9c   :  { %v32_v57 = vrot.slane %v31_v56, 1 }
  0x9e   :  { %v33_v58 = vadd.f32 %v32_v57, %v31_v56 }
  0xa0   :  { %157 = vpush %v33_v58 }
  0xd1   :  { %s158_s2 = spop %157 }
  0xd2   :  { %v137_v59 = vpop.xlane.xlu0 %136  ;;  %v149_v3 = vstv %s158_s2 }
  0xd3   :  { %v138_v60 = vrot.slane %v137_v59, 4 }
  0xd5   :  { %v139_v61 = vadd.f32 %v138_v60, %v137_v59 }
  0xd7   :  { %v140_v62 = vrot.slane %v139_v61, 2 }
  0xd9   :  { %v141_v63 = vadd.f32 %v140_v62, %v139_v61 }
  0xdb   :  { %v142_v0 = vrot.slane %v141_v63, 1 }
  0xdd   :  { %v143_v1 = vadd.f32 %v142_v0, %v141_v63 }
  0xdf   :  { %159 = vpush %v143_v1 }
 0x110   :  { %s160_s3 = spop %159 }
 0x111   :  { %v147_v2 = vstv %s160_s3 }
 0x112   :  { %v148_v4 = vsel %vm146_vm5, %v147_v2, 0.0 }
 0x113   :  { %v150_v5 = vsel %vm145_vm6, %v149_v3, %v148_v4 }
 0x114   :  { %151 = vst [vmem:[%s221_s4] sm:$0xff] %v150_v5 }

</bundles_post_ra>
